<compile_context>
chip_gen: v7x
topology: tpu7x:2x2x1
jax: 0.10.0
libtpu: 0.0.40
codegen_flags: <defaults>
</compile_context>

<pallas_src>
import jax
import jax.numpy as jnp
from jax.experimental import pallas as pl
from jax.experimental.pallas import tpu as pltpu


def rnn_seq_kernel(x_ref, h0_ref,
                   w_ih_x_ref, w_ih_h_ref, b_ih_ref,
                   w_ho_ref, b_ho_ref,
                   out_ref, h_out_ref,
                   h_scratch):
    """All T RNN steps; grid axis 0 = time (sequential, "arbitrary").

    Per step (identical math to the PyTorch forward):
        hidden = [x_t, hidden] @ W_i2h.T + b_i2h
        out_t  = log_softmax(hidden @ W_h2o.T + b_h2o, axis=1)
    """
    t = pl.program_id(0)

    # Initialize the carried hidden state once; it then lives in VMEM scratch.
    @pl.when(t == 0)
    def _():
        h_scratch[...] = h0_ref[...]

    x = x_ref[0]            # (batch, input)  -- streamed per time step
    h = h_scratch[...]      # (batch, hidden) -- read BEFORE the write below

    # i2h: concat([x, h]) @ W.T  ==  x @ Wx.T + h @ Wh.T  (weights pre-split/transposed).
    hidden_new = (
        jnp.dot(x, w_ih_x_ref[...], preferred_element_type=jnp.float32)
        + jnp.dot(h, w_ih_h_ref[...], preferred_element_type=jnp.float32)
        + b_ih_ref[...]
    )
    h_scratch[...] = hidden_new

    # h2o + numerically-stable log_softmax (exp/log run on the EUP slot).
    logits = (
        jnp.dot(hidden_new, w_ho_ref[...], preferred_element_type=jnp.float32)
        + b_ho_ref[...]
    )
    m = jnp.max(logits, axis=-1, keepdims=True)
    shifted = logits - m
    lse = jnp.log(jnp.sum(jnp.exp(shifted), axis=-1, keepdims=True))

    # Output slab stays VMEM-resident across the whole grid; one HBM writeback at the end.
    out_ref[t] = (shifted - lse).astype(out_ref.dtype)

    @pl.when(t == pl.num_programs(0) - 1)
    def _():
        h_out_ref[...] = hidden_new.astype(h_out_ref.dtype)


def prepare_params(w_i2h, b_i2h, w_h2o, b_h2o, input_size):
    """One-time parameter setup (hoisted out of the per-call path)."""
    hidden_size = w_i2h.shape[0]
    output_size = w_h2o.shape[0]
    w_ih_x = jnp.transpose(w_i2h[:, :input_size])        # [input, hidden]
    w_ih_h = jnp.transpose(w_i2h[:, input_size:])         # [hidden, hidden]
    w_ho_t = jnp.transpose(w_h2o)                          # [hidden, output]
    b_ih_2d = b_i2h.reshape(1, hidden_size)
    b_ho_2d = b_h2o.reshape(1, output_size)
    return (w_ih_x, w_ih_h, b_ih_2d, w_ho_t, b_ho_2d)


@jax.jit
def rnn_forward_sequence(xs, h0, params):
    """Run T RNN steps in one pallas_call.

    xs: [T, batch, input], h0: [batch, hidden]
    Returns (out: [T, batch, output] log-probs, h_T: [batch, hidden]).
    """
    w_ih_x, w_ih_h, b_ih, w_ho, b_ho = params
    T, batch, input_size = xs.shape
    hidden_size = h0.shape[1]
    output_size = w_ho.shape[1]

    flops = T * (2 * batch * (input_size + hidden_size) * hidden_size
                 + 2 * batch * hidden_size * output_size
                 + 6 * batch * output_size)
    bytes_accessed = 4 * (xs.size + h0.size + w_ih_x.size + w_ih_h.size
                          + b_ih.size + w_ho.size + b_ho.size
                          + T * batch * output_size + batch * hidden_size)

    out, h_final = pl.pallas_call(
        rnn_seq_kernel,
        out_shape=(
            jax.ShapeDtypeStruct((T, batch, output_size), jnp.float32),
            jax.ShapeDtypeStruct((batch, hidden_size), jnp.float32),
        ),
        grid_spec=pltpu.PrefetchScalarGridSpec(
            num_scalar_prefetch=0,
            grid=(T,),
            in_specs=[
                # x_t streamed along the time axis.
                pl.BlockSpec((1, batch, input_size), lambda t: (t, 0, 0)),
                # Everything below: constant index -> fetched once, VMEM-resident.
                pl.BlockSpec((batch, hidden_size), lambda t: (0, 0)),
                pl.BlockSpec((input_size, hidden_size), lambda t: (0, 0)),
                pl.BlockSpec((hidden_size, hidden_size), lambda t: (0, 0)),
                pl.BlockSpec((1, hidden_size), lambda t: (0, 0)),
                pl.BlockSpec((hidden_size, output_size), lambda t: (0, 0)),
                pl.BlockSpec((1, output_size), lambda t: (0, 0)),
            ],
            out_specs=(
                # Whole output slab resident; single writeback at grid end.
                pl.BlockSpec((T, batch, output_size), lambda t: (0, 0, 0)),
                pl.BlockSpec((batch, hidden_size), lambda t: (0, 0)),
            ),
            scratch_shapes=[pltpu.VMEM((batch, hidden_size), jnp.float32)],
        ),
        compiler_params=pltpu.CompilerParams(
            dimension_semantics=("arbitrary",),   # hidden state carries across time
        ),
        cost_estimate=pl.CostEstimate(
            flops=flops,
            transcendentals=T * batch * (output_size + 1),
            bytes_accessed=bytes_accessed,
        ),
    )(xs, h0, w_ih_x, w_ih_h, b_ih, w_ho, b_ho)
    return out, h_final


def rnn_forward(x, h, params):
    """Single-step forward matching the PyTorch module exactly: returns (out, hidden)."""
    out, h_new = rnn_forward_sequence(x[None], h, params)
    return out[0], h_new


def ref_forward_sequence(xs, h, w_i2h, b_i2h, w_h2o, b_h2o):
    """Plain-JAX reference: loop of the PyTorch forward."""
    outs = []
    for t in range(xs.shape[0]):
        concat = jnp.concatenate([xs[t], h], axis=1)
        h = concat @ w_i2h.T + b_i2h
        logits = h @ w_h2o.T + b_h2o
        outs.append(jax.nn.log_softmax(logits, axis=1))
    return jnp.stack(outs, axis=0), h


if __name__ == "__main__":
    # Small shapes consistent with the module's forward.
    T = 8
    batch = 2
    input_size = 16
    hidden_size = 32
    output_size = 8

    key = jax.random.PRNGKey(0)
    kx, k1, k2, k3, k4 = jax.random.split(key, 5)

    xs = jax.random.normal(kx, (T, batch, input_size), dtype=jnp.float32)
    h0 = jnp.zeros((batch, hidden_size), dtype=jnp.float32)   # init_hidden()

    # Deterministic parameter init (PyTorch Linear shapes: weight [out, in], bias [out]).
    fan_i2h = input_size + hidden_size
    w_i2h = jax.random.uniform(k1, (hidden_size, fan_i2h), jnp.float32,
                               -1.0 / jnp.sqrt(fan_i2h), 1.0 / jnp.sqrt(fan_i2h))
    b_i2h = jax.random.uniform(k2, (hidden_size,), jnp.float32,
                               -1.0 / jnp.sqrt(fan_i2h), 1.0 / jnp.sqrt(fan_i2h))
    w_h2o = jax.random.uniform(k3, (output_size, hidden_size), jnp.float32,
                               -1.0 / jnp.sqrt(hidden_size), 1.0 / jnp.sqrt(hidden_size))
    b_h2o = jax.random.uniform(k4, (output_size,), jnp.float32,
                               -1.0 / jnp.sqrt(hidden_size), 1.0 / jnp.sqrt(hidden_size))

    # One-time parameter prep (transposes/splits hoisted out of the forward path).
    params = prepare_params(w_i2h, b_i2h, w_h2o, b_h2o, input_size)

    # Fused T-step kernel.
    out_seq, h_final = rnn_forward_sequence(xs, h0, params)
    jax.block_until_ready((out_seq, h_final))

    # Reference check (same math as the PyTorch forward, looped in plain JAX).
    out_ref, h_ref = ref_forward_sequence(xs, h0, w_i2h, b_i2h, w_h2o, b_h2o)
    assert jnp.allclose(h_final, h_ref, atol=1e-4, rtol=1e-4), "hidden mismatch"
    assert jnp.allclose(out_seq, out_ref, atol=1e-4, rtol=1e-4), "logsoftmax mismatch"

    # Single-step interface matches the module's forward(input_, hidden) exactly.
    out1, h1 = rnn_forward(xs[0], h0, params)
    jax.block_until_ready((out1, h1))
    assert jnp.allclose(out1, out_ref[0], atol=1e-4, rtol=1e-4), "single-step out mismatch"
    assert jnp.allclose(h1, (jnp.concatenate([xs[0], h0], axis=1) @ w_i2h.T + b_i2h),
                        atol=1e-4, rtol=1e-4), "single-step hidden mismatch"

    print("KERNEL_OK")
</pallas_src>

<mosaic_0001>
module attributes {stable_mosaic.version = 11 : i64} {
  func.func @rnn_seq_kernel(%arg0: i32, %arg1: memref<1x2x16xf32, #tpu.memory_space<vmem>>, %arg2: memref<2x32xf32, #tpu.memory_space<vmem>>, %arg3: memref<16x32xf32, #tpu.memory_space<vmem>>, %arg4: memref<32x32xf32, #tpu.memory_space<vmem>>, %arg5: memref<1x32xf32, #tpu.memory_space<vmem>>, %arg6: memref<32x8xf32, #tpu.memory_space<vmem>>, %arg7: memref<1x8xf32, #tpu.memory_space<vmem>>, %arg8: memref<8x2x8xf32, #tpu.memory_space<vmem>>, %arg9: memref<2x32xf32, #tpu.memory_space<vmem>>, %arg10: memref<2x32xf32, #tpu.memory_space<vmem>>) attributes {dimension_semantics = [#tpu.dimension_semantics<arbitrary>], iteration_bounds = array<i64: 8>, scalar_prefetch = 0 : i64, scratch_operands = 1 : i64, tpu.core_type = #tpu.core_type<tc>, window_params = [{transform_indices = @transform_0, window_bounds = array<i64: 1, 2, 16>}, {pipeline_mode = #tpu.pipeline_mode<synchronous>, transform_indices = @transform_1, window_bounds = array<i64: 2, 32>}, {pipeline_mode = #tpu.pipeline_mode<synchronous>, transform_indices = @transform_2, window_bounds = array<i64: 16, 32>}, {pipeline_mode = #tpu.pipeline_mode<synchronous>, transform_indices = @transform_3, window_bounds = array<i64: 32, 32>}, {pipeline_mode = #tpu.pipeline_mode<synchronous>, transform_indices = @transform_4, window_bounds = array<i64: 1, 32>}, {pipeline_mode = #tpu.pipeline_mode<synchronous>, transform_indices = @transform_5, window_bounds = array<i64: 32, 8>}, {pipeline_mode = #tpu.pipeline_mode<synchronous>, transform_indices = @transform_6, window_bounds = array<i64: 1, 8>}, {pipeline_mode = #tpu.pipeline_mode<synchronous>, transform_indices = @transform_7, window_bounds = array<i64: 8, 2, 8>}, {pipeline_mode = #tpu.pipeline_mode<synchronous>, transform_indices = @transform_8, window_bounds = array<i64: 2, 32>}]} {
    %c0_i32 = arith.constant 0 : i32
    %0 = arith.cmpi eq, %arg0, %c0_i32 : i32
    %1 = arith.extui %0 : i1 to i32
    %c0_i32_0 = arith.constant 0 : i32
    %2 = arith.cmpi ne, %1, %c0_i32_0 : i32
    scf.if %2 {
      %c0_24 = arith.constant 0 : index
      %c0_25 = arith.constant 0 : index
      %37 = vector.load %arg2[%c0_24, %c0_25] : memref<2x32xf32, #tpu.memory_space<vmem>>, vector<2x32xf32>
      %c0_26 = arith.constant 0 : index
      %c0_27 = arith.constant 0 : index
      %38 = vector.load %arg10[%c0_26, %c0_27] : memref<2x32xf32, #tpu.memory_space<vmem>>, vector<2x32xf32>
      tpu.vector_store %arg10[%c0_26, %c0_27], %37 {strides = array<i32>} : memref<2x32xf32, #tpu.memory_space<vmem>>, vector<2x32xf32>,
    } else {
    }
    %c0 = arith.constant 0 : index
    %c0_1 = arith.constant 0 : index
    %c0_2 = arith.constant 0 : index
    %3 = vector.load %arg1[%c0, %c0_1, %c0_2] : memref<1x2x16xf32, #tpu.memory_space<vmem>>, vector<1x2x16xf32>
    %4 = vector.shape_cast %3 : vector<1x2x16xf32> to vector<2x16xf32>
    %c0_3 = arith.constant 0 : index
    %c0_4 = arith.constant 0 : index
    %5 = vector.load %arg10[%c0_3, %c0_4] : memref<2x32xf32, #tpu.memory_space<vmem>>, vector<2x32xf32>
    %c0_5 = arith.constant 0 : index
    %c0_6 = arith.constant 0 : index
    %6 = vector.load %arg3[%c0_5, %c0_6] : memref<16x32xf32, #tpu.memory_space<vmem>>, vector<16x32xf32>
    %cst = arith.constant dense<0.000000e+00> : vector<2x32xf32>
    %7 = tpu.matmul %4, %6, %cst {dimension_numbers = #tpu.dot_dimension_numbers<[1], [0], [0], [1], [0, 0, 1, 1], [], []>} : vector<2x16xf32>, vector<16x32xf32>, vector<2x32xf32> -> vector<2x32xf32>
    %c0_7 = arith.constant 0 : index
    %c0_8 = arith.constant 0 : index
    %8 = vector.load %arg4[%c0_7, %c0_8] : memref<32x32xf32, #tpu.memory_space<vmem>>, vector<32x32xf32>
    %cst_9 = arith.constant dense<0.000000e+00> : vector<2x32xf32>
    %9 = tpu.matmul %5, %8, %cst_9 {dimension_numbers = #tpu.dot_dimension_numbers<[1], [0], [0], [1], [0, 0, 1, 1], [], []>} : vector<2x32xf32>, vector<32x32xf32>, vector<2x32xf32> -> vector<2x32xf32>
    %10 = arith.addf %7, %9 : vector<2x32xf32>
    %c0_10 = arith.constant 0 : index
    %c0_11 = arith.constant 0 : index
    %11 = vector.load %arg5[%c0_10, %c0_11] : memref<1x32xf32, #tpu.memory_space<vmem>>, vector<1x32xf32>
    %12 = vector.broadcast %11 : vector<1x32xf32> to vector<2x32xf32>
    %13 = arith.addf %10, %12 : vector<2x32xf32>
    %c0_12 = arith.constant 0 : index
    %c0_13 = arith.constant 0 : index
    %14 = vector.load %arg10[%c0_12, %c0_13] : memref<2x32xf32, #tpu.memory_space<vmem>>, vector<2x32xf32>
    tpu.vector_store %arg10[%c0_12, %c0_13], %13 {strides = array<i32>} : memref<2x32xf32, #tpu.memory_space<vmem>>, vector<2x32xf32>,
    %c0_14 = arith.constant 0 : index
    %c0_15 = arith.constant 0 : index
    %15 = vector.load %arg6[%c0_14, %c0_15] : memref<32x8xf32, #tpu.memory_space<vmem>>, vector<32x8xf32>
    %cst_16 = arith.constant dense<0.000000e+00> : vector<2x8xf32>
    %16 = tpu.matmul %13, %15, %cst_16 {dimension_numbers = #tpu.dot_dimension_numbers<[1], [0], [0], [1], [0, 0, 1, 1], [], []>} : vector<2x32xf32>, vector<32x8xf32>, vector<2x8xf32> -> vector<2x8xf32>
    %c0_17 = arith.constant 0 : index
    %c0_18 = arith.constant 0 : index
    %17 = vector.load %arg7[%c0_17, %c0_18] : memref<1x8xf32, #tpu.memory_space<vmem>>, vector<1x8xf32>
    %18 = vector.broadcast %17 : vector<1x8xf32> to vector<2x8xf32>
    %19 = arith.addf %16, %18 : vector<2x8xf32>
    %cst_19 = arith.constant dense<0xFF800000> : vector<2xf32>
    %20 = vector.multi_reduction <maximumf>, %19, %cst_19 [1] : vector<2x8xf32> to vector<2xf32>
    %21 = vector.shape_cast %20 : vector<2xf32> to vector<2x1xf32>
    %22 = vector.broadcast %21 : vector<2x1xf32> to vector<2x8xf32>
    %23 = arith.subf %19, %22 : vector<2x8xf32>
    %24 = math.exp %23 : vector<2x8xf32>
    %cst_20 = arith.constant dense<0.000000e+00> : vector<2xf32>
    %25 = vector.multi_reduction <add>, %24, %cst_20 [1] : vector<2x8xf32> to vector<2xf32>
    %26 = vector.shape_cast %25 : vector<2xf32> to vector<2x1xf32>
    %27 = math.log %26 : vector<2x1xf32>
    %28 = vector.broadcast %27 : vector<2x1xf32> to vector<2x8xf32>
    %29 = arith.subf %23, %28 : vector<2x8xf32>
    %30 = arith.index_cast %arg0 : i32 to index
    %c0_21 = arith.constant 0 : index
    %c0_22 = arith.constant 0 : index
    %31 = vector.load %arg8[%30, %c0_21, %c0_22] : memref<8x2x8xf32, #tpu.memory_space<vmem>>, vector<1x2x8xf32>
    %32 = vector.shape_cast %31 : vector<1x2x8xf32> to vector<2x8xf32>
    %33 = vector.shape_cast %29 : vector<2x8xf32> to vector<1x2x8xf32>
    tpu.vector_store %arg8[%30, %c0_21, %c0_22], %33 {strides = array<i32>} : memref<8x2x8xf32, #tpu.memory_space<vmem>>, vector<1x2x8xf32>,
    %c7_i32 = arith.constant 7 : i32
    %34 = arith.cmpi eq, %arg0, %c7_i32 : i32
    %35 = arith.extui %34 : i1 to i32
    %c0_i32_23 = arith.constant 0 : i32
    %36 = arith.cmpi ne, %35, %c0_i32_23 : i32
    scf.if %36 {
      %c0_24 = arith.constant 0 : index
      %c0_25 = arith.constant 0 : index
      %37 = vector.load %arg9[%c0_24, %c0_25] : memref<2x32xf32, #tpu.memory_space<vmem>>, vector<2x32xf32>
      tpu.vector_store %arg9[%c0_24, %c0_25], %13 {strides = array<i32>} : memref<2x32xf32, #tpu.memory_space<vmem>>, vector<2x32xf32>,
    } else {
    }
    return
  }
  func.func @transform_0(%arg0: i32) -> (i32, i32, i32) {
    %c0_i32 = arith.constant 0 : i32
    %c0_i32_0 = arith.constant 0 : i32
    %c0_i32_1 = arith.constant 0 : i32
    return %arg0, %c0_i32, %c0_i32_0 : i32, i32, i32
  }
  func.func @transform_1(%arg0: i32) -> (i32, i32) {
    %c0_i32 = arith.constant 0 : i32
    %c0_i32_0 = arith.constant 0 : i32
    %c0_i32_1 = arith.constant 0 : i32
    return %c0_i32, %c0_i32_0 : i32, i32
  }
  func.func @transform_2(%arg0: i32) -> (i32, i32) {
    %c0_i32 = arith.constant 0 : i32
    %c0_i32_0 = arith.constant 0 : i32
    %c0_i32_1 = arith.constant 0 : i32
    return %c0_i32, %c0_i32_0 : i32, i32
  }
  func.func @transform_3(%arg0: i32) -> (i32, i32) {
    %c0_i32 = arith.constant 0 : i32
    %c0_i32_0 = arith.constant 0 : i32
    %c0_i32_1 = arith.constant 0 : i32
    return %c0_i32, %c0_i32_0 : i32, i32
  }
  func.func @transform_4(%arg0: i32) -> (i32, i32) {
    %c0_i32 = arith.constant 0 : i32
    %c0_i32_0 = arith.constant 0 : i32
    %c0_i32_1 = arith.constant 0 : i32
    return %c0_i32, %c0_i32_0 : i32, i32
  }
  func.func @transform_5(%arg0: i32) -> (i32, i32) {
    %c0_i32 = arith.constant 0 : i32
    %c0_i32_0 = arith.constant 0 : i32
    %c0_i32_1 = arith.constant 0 : i32
    return %c0_i32, %c0_i32_0 : i32, i32
  }
  func.func @transform_6(%arg0: i32) -> (i32, i32) {
    %c0_i32 = arith.constant 0 : i32
    %c0_i32_0 = arith.constant 0 : i32
    %c0_i32_1 = arith.constant 0 : i32
    return %c0_i32, %c0_i32_0 : i32, i32
  }
  func.func @transform_7(%arg0: i32) -> (i32, i32, i32) {
    %c0_i32 = arith.constant 0 : i32
    %c0_i32_0 = arith.constant 0 : i32
    %c0_i32_1 = arith.constant 0 : i32
    %c0_i32_2 = arith.constant 0 : i32
    return %c0_i32, %c0_i32_0, %c0_i32_1 : i32, i32, i32
  }
  func.func @transform_8(%arg0: i32) -> (i32, i32) {
    %c0_i32 = arith.constant 0 : i32
    %c0_i32_0 = arith.constant 0 : i32
    %c0_i32_1 = arith.constant 0 : i32
    return %c0_i32, %c0_i32_0 : i32, i32
  }
}

</mosaic_0001>

<bundles_post_ra>
// kernel: rnn_forward_sequence.1
= control target key start
LH: loop header
LB: loop body
LE: loop exit
PB: predicated region body
PF: predicated region fallthrough
CT: control target
= control target key end

     0   :  { %14 = vsyncpa [#allocation4], 0  ;;  %s1191_s0 = inlined_call_operand.vmem [shape: f32[8,2,16], index: 0, kind: input, shape index: {}]   ;;  %s1192_s1 = inlined_call_operand.vmem [shape: f32[2,32], index: 1, kind: input, shape index: {}]   ;;  %s1193_s2 = inlined_call_operand.hbm [shape: f32[16,32], index: 2, kind: input, shape index: {}]   ;;  %s1194_s3 = inlined_call_operand.vmem [shape: f32[32,32], index: 3, kind: input, shape index: {}]   ;;  %s1195_s4 = inlined_call_operand.hbm [shape: f32[1,32], index: 4, kind: input, shape index: {}]   ;;  %s1196_s5 = inlined_call_operand.vmem [shape: f32[32,8], index: 5, kind: input, shape index: {}]   ;;  %s1197_s6 = inlined_call_operand.vmem [shape: f32[1,8], index: 6, kind: input, shape index: {}]   ;;  %s1198_s7 = inlined_call_operand.hbm [shape: f32[8,2,8], index: 7, kind: output, shape index: {0}]   ;;  %s1199_s8 = inlined_call_operand.hbm [shape: f32[2,32], index: 8, kind: output, shape index: {1}]  }
   0x1   :  { %15 = vsyncpa [#allocation7], 0 }
   0x2   :  { %16 = vsyncpa [#allocation5], 0 }
   0x3   :  { %17 = vsyncpa [#allocation10], 0  ;;  %s1010_s27 = smov 0  }
   0x4 LB: > { %s1016_s28 = sadd.s32 4294967295, %s952_s27   ;;  %p689_p0 = scmp.ge.s32.totalorder %s952_s27, 1  ;;  %s952_s27 = sphi %s1010_s27, %s23_s27  }
   0x5   : > { %p222_p1 = scmp.lt.s32.totalorder %s952_s27, 9  ;;  %s954_s29 = smov [#allocation3]  }
   0x6   : > { %s237_s30 = sshll.u32 %s954_s29, 4  ;;  %p1200_p4 = scmp.eq.s32.totalorder %s1016_s28, 0  ;;  %s238_s30 = int_to_ptr.vmem [resolvable:$true] %s237_s30 }
   0x7   : > { %p1021_p3 = pnand %p689_p0, %p222_p1  ;;  %s955_s10 = smov [#allocation6]  }
   0x8   : > { %s254_s11 = sshll.u32 %s955_s10, 4  ;;  %s822_s15 = scalar_lea.hbm %s1193_s2, 256  ;;  %s1034_s11 = int_to_ptr.vmem [resolvable:$true] %s254_s11 }
   0x9   : > { %s1202_s9 = scalar_select %p1021_p3, 1, 0 }
   0xa   : > { %p784_p5 = pneg %p1021_p3  ;;  %p823_p7 = scmp.ne.s32.totalorder %s1193_s2, %s822_s15 }
   0xb   : > { %p829_p11 = scmp.lt.u32.totalorder %s822_s15, %s1193_s2 }
   0xc   : > { %p1030_p6 = pnand %p1200_p4, %p784_p5 }
   0xe   : > { %p824_p8 = pneg %p1030_p6 }
  0x10   : > { %p825_p9 = pnand %p824_p8, %p823_p7 }
  0x12   : > { %p826_p10 = pneg %p825_p9 }
  0x14   : > { %p831_p12 = pnand %p829_p11, %p826_p10 }
  0x16   : > { %834 = shalt.err (!%p831_p12)
}
  0x17   : > { %s835_s20 = scalar_lea.vmem %s238_s30, 256  ;;  %p843_p5 = scmp.lt.s32.totalorder %s238_s30, %s238_s30 }
  0x18   : > { %p836_p13 = scmp.ne.s32.totalorder %s238_s30, %s835_s20  ;;  %p844_p2 = scmp.lt.s32.totalorder %s835_s20, %s835_s20 }
  0x1a   : > { %p838_p0 = pnand %p836_p13, %p824_p8  ;;  %p845_p4 = por %p844_p2, %p843_p5 }
  0x1c   : > { %p839_p1 = pneg %p838_p0 }
  0x1e   : > { %p846_p3 = pnand %p845_p4, %p839_p1 }
  0x20   : > { %849 = shalt.err (!%p846_p3)
}
  0x21   : > { %s956_s21 = smov 128   ;;  %s957_s22 = smov 8  }
  0x22   : > { %787 = dma.hbm_to_vmem [thread:$0]  (!%p1030_p6), %s1193_s2, 256, %s238_s30, [#allocation4], %s956_s21, %s956_s21, %s957_s22  }
  0x23   : > { %s850_s29 = scalar_lea.hbm %s1195_s4, 16 }
  0x24   : > { %p851_p7 = scmp.ne.s32.totalorder %s1195_s4, %s850_s29  ;;  %p857_p4 = scmp.lt.u32.totalorder %s850_s29, %s1195_s4 }
  0x26   : > { %p853_p2 = pnand %p851_p7, %p824_p8 }
  0x28   : > { %p854_p3 = pneg %p853_p2 }
  0x2a   : > { %p859_p9 = pnand %p857_p4, %p854_p3 }
  0x2c   : > { %862 = shalt.err (!%p859_p9)
}
  0x2d   : > { %s863_s30 = scalar_lea.vmem %s1034_s11, 16  ;;  %s870_s16 = scalar_lea.vmem %s1034_s11, 32 }
  0x2e   : > { %p864_p10 = scmp.ne.s32.totalorder %s1034_s11, %s863_s30  ;;  %p871_p13 = scmp.lt.s32.totalorder %s1034_s11, %s1034_s11 }
  0x2f   : > { %p872_p0 = scmp.lt.s32.totalorder %s870_s16, %s863_s30 }
  0x30   : > { %p866_p11 = pnand %p864_p10, %p824_p8 }
  0x31   : > { %p873_p1 = por %p872_p0, %p871_p13 }
  0x32   : > { %p867_p12 = pneg %p866_p11 }
  0x34   : > { %p874_p5 = pnand %p873_p1, %p867_p12 }
  0x36   : > { %877 = shalt.err (!%p874_p5)
}
  0x37   : > { %790 = dma.hbm_to_vmem [thread:$0]  (!%p1030_p6), %s1195_s4, 16, %s1034_s11, [#allocation7]  }
  0x38   : > { %p1204_p7 = scmp.ne.s32.totalorder %s1202_s9, 0 }
  0x39   : > { %p1205_p8 = scmp.eq.s32.totalorder (!%p1204_p7), %s1016_s28, 0 }
  0x3a   : > { %280 = sbr.rel (%p1204_p7) target bundleno = 888 (0x378), region = 48 }
  0x41   : > { %935 = dma.done.wait (%p1205_p8), [#allocation4], 256   ;;  %p1206_p2 = pmov %p1205_p8 }
  0x43   : > { %937 = vsyncadd (%p1206_p2), [#allocation4], 4294967040  ;;  %p1207_p3 = pmov %p1206_p2 }
  0x44   : > { %p1208_p4 = pmov %p1206_p2 }
  0x45   : > { %939 = dma.done.wait (%p1207_p3), [#allocation7], 16  }
  0x46   : > { %941 = vsyncadd (%p1208_p4), [#allocation7], 4294967280  ;;  %p312_p9 = scmp.lt.s32.totalorder %s1016_s28, 7  ;;  %p1209_p6 = scmp.ne.s32.totalorder %s1016_s28, 0 }
  0x47   : > { %v320_v0 = vld [vmem:[%s1192_s1] sm:$0x3] (!%p1209_p6)  ;;  %vm321_vm0 = vcmask (!%p1209_p6), 254976  }
  0x48   : > { %s313_s12 = scalar_select %p312_p9, %s1016_s28, 7 }
  0x49   : > { %319 = sbr.rel (%p1209_p6) target bundleno = 80 (0x50), region = 60  ;;  %322 = vst.msk [vmem:[#allocation2] sm:$0x3] (!%p1209_p6), %vm321_vm0, %v320_v0 }
  0x4a   : > { %s696_s11 = sshll.u32 %s313_s12, 1 }
  0x4b   : > { %s315_s20 = scalar_lea.vmem %s1191_s0, %s696_s11 }
  0x50 PF: > { %v327_v1 = vld [vmem:[%s1194_s3] sm:$0xff]  ;;  %v328_v2 = vld [vmem:[%s1194_s3 + $0x8] sm:$0xff]  ;;  %v958_v4 = vmov 0.0|0.0   ;;  %v329_v7 = vld [vmem:[%s1194_s3 + $0x10] sm:$0xff]  ;;  %vm959_vm1 = vmmov 0   ;;  %v960_v10 = vmov 0.0  }
  0x51   : > { %v325_v3 = vld [vmem:[#allocation3] sm:$0xff]  ;;  %753 = vmatprep.subr.bf16.mxu0 %v958_v4  ;;  %v754_v5 = vpack.c.bf16 %v328_v2, %v327_v1  ;;  %759 = vmatprep.subr.bf16.mxu1 %v958_v4  ;;  %v326_v6 = vld [vmem:[#allocation3 + $0x8] sm:$0xff]  ;;  %v330_v8 = vld [vmem:[%s1194_s3 + $0x18] sm:$0xff]  ;;  %vm405_vm2 = vcmask 130048   ;;  %vm331_vm3 = vcmask 261120   ;;  %vm487_vm4 = vcmask 254976  }
  0x52   : > { %v760_v9 = vpack.c.bf16 %v326_v6, %v325_v3  ;;  %739 = vmatprep.mubr.msk.f32.mxu1 %vm959_vm1, %v960_v10  ;;  %732 = vmatprep.mubr.msk.f32.mxu0 %vm959_vm1, %v960_v10  ;;  %v489_v11 = vld [vmem:[%s1196_s5] sm:$0xff]  ;;  %v757_v12 = vpack.c.bf16 %v330_v8, %v329_v7  ;;  %v490_v13 = vld [vmem:[%s1196_s5 + $0x8] sm:$0xff]  ;;  %v491_v17 = vld [vmem:[%s1196_s5 + $0x10] sm:$0xff]  ;;  %vm573_vm5 = vcmask 58368   ;;  %s703_s21 = sshll.u32 %s1016_s28, 1  ;;  %p704_p10 = scmp.ne.s32.totalorder %s1016_s28, 7 }
  0x53   : > { %755 = vmatpush3.bf16.msra.mxu0 %v754_v5  ;;  %v323_v14 = vld [vmem:[%s315_s20] sm:$0x3]  ;;  %v763_v15 = vpack.c.bf16 %v490_v13, %v489_v11  ;;  %v492_v18 = vld [vmem:[%s1196_s5 + $0x18] sm:$0xff]  ;;  %v700_v23 = vld [vmem:[#allocation6] ss:$0 sm:$0xff]  ;;  %s587_s22 = scalar_lea.vmem [#allocation8], %s703_s21 }
  0x54   : > { %756 = vmatprep.subr.bf16.mxu0 %v958_v4  ;;  %761 = vmatpush3.bf16.msra.mxu1 %v760_v9  ;;  %v324_v16 = vld [vmem:[#allocation2] sm:$0x3]  ;;  %v766_v19 = vpack.c.bf16 %v492_v18, %v491_v17 }
  0x55   : > { %762 = vmatprep.subr.bf16.mxu1 %v958_v4  ;;  %v701_v27 = vld [vmem:[%s1197_s6] ss:$0 sm:$0xff] }
  0x57   : > { %758 = vmatpush3.bf16.msra.mxu0 %v757_v12  ;;  %740 = vmatmul.mubr.msk.f32.vlgmr.msra.gmra.mrb[0].mxu1 %vm405_vm2, %v323_v14 }
  0x58   : > { %764 = vmatpush3.bf16.msra.mxu1 %v763_v15  ;;  %750 = vmatprep.mubr.msk.f32.mxu1 %vm959_vm1, %v960_v10 }
  0x59   : > { %765 = vmatprep.subr.bf16.mxu1 %v958_v4 }
  0x5a   : > { %733 = vmatmul.mubr.msk.f32.vlgmr.msra.gmra.mrb[0].mxu0 %vm331_vm3, %v324_v16 }
  0x5c   : > { %767 = vmatpush3.bf16.msra.mxu1 %v766_v19 }
 0x12a   : > { %v475_v20 = vpop.f32.mrb[0].mxu1 }
 0x12b   : > { %v741_v21 = vpop.f32.mrb[1].mxu1 }
 0x12d   : > { %v401_v22 = vpop.f32.mrb[0].mxu0 }
 0x12e   : > { %v476_v24 = vadd.f32 %v475_v20, %v401_v22  ;;  %v734_v25 = vpop.f32.mrb[1].mxu0 }
 0x130   : > { %v486_v26 = vadd.f32 %v700_v23, %v476_v24 }
 0x132   : > { %488 = vst.msk [vmem:[#allocation2] sm:$0x3] %vm487_vm4, %v486_v26  ;;  %751 = vmatmul.mubr.msk.f32.vlgmr.msra.gmra.mrb[2].mxu1 %vm331_vm3, %v486_v26  ;;  %593 = vst.msk [vmem:[#allocation9] sm:$0x3] (!%p704_p10), %vm487_vm4, %v486_v26 }
 0x205   : > { %v569_v28 = vpop.f32.mrb[2].mxu1 }
 0x206   : > { %v570_v29 = vadd.f32 %v701_v27, %v569_v28  ;;  %v752_v30 = vpop.f32.mrb[3].mxu1 }
 0x208   : > { %v574_v31 = vsel %vm573_vm5, %v570_v29, -inf }
 0x209   : > { %575 = vmax.xlane.f32.xlu0 %v574_v31 }
 0x296   : > { %v576_v32 = vpop.xlane.xlu0 %575 }
 0x297   : > { %v577_v33 = vsub.f32 %v570_v29, %v576_v32 }
 0x299   : > { %v578_v34 = vmul.f32 1.442695, %v577_v33 }
 0x29b   : > { %818 = vpow2.f32 %v578_v34 }
 0x2a5   : > { %v819_v35 = vpop.eup %818 }
 0x2a6   : > { %v580_v36 = vsel %vm573_vm5, %v819_v35, 0.0 }
 0x2a7   : > { %581 = vadd.xlane.f32.xlu0 %v580_v36 }
 0x334   : > { %v582_v37 = vpop.xlane.xlu0 %581 }
 0x335   : > { %820 = vlog2.f32 %v582_v37 }
 0x33e   : > { %592 = sbr.rel (%p704_p10) target bundleno = 837 (0x345), region = 64 }
 0x33f   : > { %v821_v38 = vpop.eup %820 }
 0x340   : > { %v584_v39 = vmul.f32 0.6931472, %v821_v38 }
 0x342   : > { %v585_v40 = vsub.f32 %v577_v33, %v584_v39 }
 0x344   : > { %588 = vst.msk [vmem:[%s587_s22] sm:$0x3] %vm573_vm5, %v585_v40 }
 0x345 PF: > { %p795_p11 = scmp.eq.s32.totalorder %s1016_s28, 7  ;;  %s961_s23 = smov [#allocation8]  }
 0x346   : > { %s600_s24 = sshll.u32 %s961_s23, 4  ;;  %s601_s24 = int_to_ptr.vmem [resolvable:$true] %s600_s24 }
 0x347   : > { %s878_s25 = scalar_lea.vmem %s601_s24, 256  ;;  %p885_p1 = scmp.lt.s32.totalorder %s601_s24, %s601_s24 }
 0x348   : > { %p879_p12 = scmp.ne.s32.totalorder %s601_s24, %s878_s25  ;;  %p886_p5 = scmp.lt.s32.totalorder %s878_s25, %s878_s25 }
 0x34a   : > { %p880_p13 = pnand %p879_p12, %p795_p11  ;;  %p887_p7 = por %p886_p5, %p885_p1 }
 0x34c   : > { %p881_p0 = pneg %p880_p13 }
 0x34e   : > { %p888_p8 = pnand %p887_p7, %p881_p0 }
 0x350   : > { %891 = shalt.err (!%p888_p8)
}
 0x351   : > { %s892_s10 = scalar_lea.hbm %s1198_s7, 256 }
 0x352   : > { %p893_p2 = scmp.ne.s32.totalorder %s1198_s7, %s892_s10  ;;  %p898_p9 = scmp.lt.u32.totalorder %s892_s10, %s1198_s7 }
 0x354   : > { %p894_p3 = pnand %p893_p2, %p795_p11 }
 0x356   : > { %p895_p4 = pneg %p894_p3 }
 0x358   : > { %p900_p6 = pnand %p898_p9, %p895_p4 }
 0x35a   : > { %903 = shalt.err (!%p900_p6)
}
 0x35b   : > { %s962_s16 = smov 32   ;;  %s963_s17 = smov 2  }
 0x35c   : > { %777 = dma.vmem_to_hbm [thread:$0]  (%p795_p11), %s601_s24, 256, %s1198_s7, [#allocation5], %s962_s16, %s962_s16, %s963_s17  }
 0x35d   : > { %s964_s11 = smov [#allocation9]  }
 0x35e   : > { %s614_s19 = sshll.u32 %s964_s11, 4  ;;  %s615_s19 = int_to_ptr.vmem [resolvable:$true] %s614_s19 }
 0x35f   : > { %s904_s9 = scalar_lea.vmem %s615_s19, 32  ;;  %p911_p0 = scmp.lt.s32.totalorder %s615_s19, %s615_s19 }
 0x360   : > { %p905_p10 = scmp.ne.s32.totalorder %s615_s19, %s904_s9  ;;  %p912_p1 = scmp.lt.s32.totalorder %s904_s9, %s904_s9 }
 0x362   : > { %p906_p12 = pnand %p905_p10, %p795_p11  ;;  %p913_p5 = por %p912_p1, %p911_p0 }
 0x364   : > { %p907_p13 = pneg %p906_p12 }
 0x366   : > { %p914_p7 = pnand %p913_p5, %p907_p13 }
 0x368   : > { %917 = shalt.err (!%p914_p7)
}
 0x369   : > { %s918_s22 = scalar_lea.hbm %s1199_s8, 32 }
 0x36a   : > { %p919_p8 = scmp.ne.s32.totalorder %s1199_s8, %s918_s22  ;;  %p924_p4 = scmp.lt.u32.totalorder %s918_s22, %s1199_s8 }
 0x36c   : > { %p920_p2 = pnand %p919_p8, %p795_p11 }
 0x36e   : > { %p921_p3 = pneg %p920_p2 }
 0x370   : > { %p926_p9 = pnand %p924_p4, %p921_p3 }
 0x372   : > { %929 = shalt.err (!%p926_p9)
}
 0x373   : > { %779 = dma.vmem_to_hbm [thread:$0]  (%p795_p11), %s615_s19, 32, %s1199_s8, [#allocation10]  }
 0x374   : > { %943 = dma.done.wait (%p795_p11), [#allocation5], 256  }
 0x375   : > { %945 = vsyncadd (%p795_p11), [#allocation5], 4294967040 }
 0x376   : > { %947 = dma.done.wait (%p795_p11), [#allocation10], 32  }
 0x377   : > { %949 = vsyncadd (%p795_p11), [#allocation10], 4294967264 }
 0x378 PF: > { %s23_s27 = sadd.s32 1, %s952_s27  }
 0x379   : > { %p20_p6 = scmp.ge.s32.totalorder %s23_s27, 10  }
 0x37b   :  { %22 = sbr.rel (!%p20_p6) target bundleno = 4 (0x4), region = 101 }
 0x382   :  { %631 = vsyncpa [#allocation4], 1 }
 0x383   :  { %633 = vsyncpa [#allocation4 + $0x1], 1 }
 0x384   :  { %634 = vsyncpa [#allocation7], 1 }
 0x385   :  { %635 = vsyncpa [#allocation5], 1 }
 0x386   :  { %637 = vsyncpa [#allocation5 + $0x1], 1 }
 0x387   :  { %638 = vsyncpa [#allocation10], 1 }

</bundles_post_ra>
